<compile_context>
chip_gen: v6e
topology: v6e:2x2x1
jax: 0.10.0
libtpu: 0.0.40
codegen_flags: <defaults>
</compile_context>

<pallas_src>
import functools

import jax
import jax.numpy as jnp
from jax.experimental import pallas as pl
from jax.experimental.pallas import tpu as pltpu


def _reduce_to_acc(x, acc_h, acc_w):
    """Reduce a (TH, TW) tile to (acc_h, acc_w) with vreg-aligned adds (no XLU)."""
    th, tw = x.shape
    if th == acc_h and tw == acc_w:
        return x
    return x.reshape(th // acc_h, acc_h, tw // acc_w, acc_w).sum(axis=(0, 2))


def _criterion_kernel(pred_ref, targ_ref, mask_ref, l1_out, cos_out, *,
                      eps, channels, height, width, acc_h, acc_w):
    # pred_ref/targ_ref: (1, C, TH, TW); mask_ref: (1, TH, TW)
    # l1_out/cos_out: (1, AH, AW) f32 per-image partials, resident across (j, k).
    j = pl.program_id(1)
    k = pl.program_id(2)

    @pl.when((j == 0) & (k == 0))
    def _():
        l1_out[...] = jnp.zeros_like(l1_out)
        cos_out[...] = jnp.zeros_like(cos_out)

    # Channel reduction: dense (TH, TW) VPU adds over the C slices.
    p0 = pred_ref[0, 0].astype(jnp.float32)
    t0 = targ_ref[0, 0].astype(jnp.float32)
    l1 = jnp.abs(p0 - t0)
    dot = p0 * t0
    nx = p0 * p0
    ny = t0 * t0

    if channels <= 16:
        # Small C: full unroll (LLO sees everything, no loop overhead).
        for c in range(1, channels):
            pc = pred_ref[0, c].astype(jnp.float32)
            tc = targ_ref[0, c].astype(jnp.float32)
            l1 = l1 + jnp.abs(pc - tc)
            dot = dot + pc * tc
            nx = nx + pc * pc
            ny = ny + tc * tc
    else:
        # Large C: bounded unroll keeps code size and vreg live ranges in check.
        def body(c, carry):
            l1_c, dot_c, nx_c, ny_c = carry
            pc = pred_ref[0, c].astype(jnp.float32)
            tc = targ_ref[0, c].astype(jnp.float32)
            return (l1_c + jnp.abs(pc - tc), dot_c + pc * tc,
                    nx_c + pc * pc, ny_c + tc * tc)
        l1, dot, nx, ny = jax.lax.fori_loop(1, channels, body,
                                            (l1, dot, nx, ny), unroll=8)

    # Mask factored out of the per-element work:
    #   |p*m - t*m| = |m| * |p - t| ;  dot/nx/ny pick up a mask^2 factor per pixel.
    # mask^2 is applied BEFORE the eps clamp so fully-masked pixels give cos = 0
    # (matches PyTorch CosineSimilarity semantics).
    am = jnp.abs(mask_ref[0].astype(jnp.float32))     # |mask|, computed once
    m2 = am * am
    cos = (dot * m2) * jax.lax.rsqrt(
        jnp.maximum((nx * m2) * (ny * m2), jnp.float32(eps * eps)))
    l1 = l1 * am

    # Edge-tile masking only exists when the tile does not divide H/W (trace-time
    # gated; _choose_tiles tries hard to pick dividing tiles so this stays off).
    th, tw = l1.shape
    if (height % th) or (width % tw):
        rows = jax.lax.broadcasted_iota(jnp.int32, (th, tw), 0) + j * th
        cols = jax.lax.broadcasted_iota(jnp.int32, (th, tw), 1) + k * tw
        valid = (rows < height) & (cols < width)
        l1 = jnp.where(valid, l1, 0.0)
        cos = jnp.where(valid, cos, 0.0)

    # Vreg-aligned tile reduction, then accumulate into the resident output block.
    l1_out[0] += _reduce_to_acc(l1, acc_h, acc_w)
    cos_out[0] += _reduce_to_acc(cos, acc_h, acc_w)


def _vmem_budget():
    """(resident-block budget, vmem_limit_bytes), gated by TPU generation."""
    try:
        info = pltpu.get_tpu_info()
        cap = getattr(info, "vmem_capacity_bytes", None) or (64 << 20)
    except Exception:  # no hw query available -> conservative (v7x-safe) defaults
        cap = 64 << 20
    if cap >= (96 << 20):          # v5e / v6e: 128 MiB physical VMEM
        return 40 << 20, 64 << 20
    return 24 << 20, 40 << 20      # v7x: 64 MiB physical VMEM per TensorCore


def _choose_tiles(c, h, w, in_itemsize, mask_itemsize, total_budget):
    """Pick (TH, TW) obeying TPU block-shape rules (last dim multiple of 128 or == W,
    2nd-last multiple of 8 or == H). Prefers TW = W (contiguous full-row channel slabs
    in NCHW) and a TH that exactly divides H so edge-tile masking stays off the hot
    path. Budget covers the whole resident footprint: 2 inputs x 2 buffers x block plus
    the double-buffered mask block."""
    def footprint(th, tw):
        return (4 * c * in_itemsize + 2 * mask_itemsize) * th * tw

    if w <= 128 or footprint(8, w) <= total_budget:
        tw = w
        if footprint(h, tw) <= total_budget:
            return h, tw                                   # whole image per grid step
        max_th = int(total_budget // footprint(1, tw))
        max_th = max(8, (max_th // 8) * 8)
        if h % 8 != 0:
            return min(max_th, h), tw
        max_th = min(max_th, (h // 8) * 8)
        best = 8
        for cand in range(max_th, 7, -8):                  # largest divisor of H
            if h % cand == 0:
                best = cand
                break
        # If the best dividing tile wastes most of the budget, take the big tile and
        # accept the (trace-time gated) edge masking instead.
        return (best if 4 * best >= max_th else max_th), tw

    # Fallback (very large C*W): 8-row slabs, lane-tile W in multiples of 128.
    th = h if h <= 8 else 8
    max_tw = int(total_budget // footprint(th, 1))
    max_tw = max(128, (max_tw // 128) * 128)
    max_tw = min(max_tw, max(128, (w // 128) * 128))
    best = 128
    for cand in range(max_tw, 127, -128):
        if w % cand == 0:
            best = cand
            break
    return th, (best if 4 * best >= max_tw else max_tw)


def my_criterion(prediction, target, mask, alpha=1.0, beta=1.0, eps=1e-8):
    """prediction/target: (N, C, H, W) (f32 or bf16); mask: (N, H, W). Scalar f32 loss."""
    n, c, h, w = prediction.shape
    in_itemsize = max(jnp.dtype(prediction.dtype).itemsize,
                      jnp.dtype(target.dtype).itemsize)
    mask_itemsize = jnp.dtype(mask.dtype).itemsize

    total_budget, vmem_limit = _vmem_budget()
    th, tw = _choose_tiles(c, h, w, in_itemsize, mask_itemsize, total_budget)
    grid = (n, pl.cdiv(h, th), pl.cdiv(w, tw))

    # Per-image partial-sum block: vreg-aligned (8, 128) when the tile allows it.
    acc_h = 8 if th % 8 == 0 else th
    acc_w = 128 if tw % 128 == 0 else tw

    kernel = functools.partial(
        _criterion_kernel, eps=float(eps), channels=c, height=h, width=w,
        acc_h=acc_h, acc_w=acc_w)

    l1_part, cos_part = pl.pallas_call(
        kernel,
        out_shape=(jax.ShapeDtypeStruct((n, acc_h, acc_w), jnp.float32),
                   jax.ShapeDtypeStruct((n, acc_h, acc_w), jnp.float32)),
        grid=grid,
        in_specs=[
            pl.BlockSpec((1, c, th, tw), lambda i, j, k: (i, 0, j, k)),
            pl.BlockSpec((1, c, th, tw), lambda i, j, k: (i, 0, j, k)),
            pl.BlockSpec((1, th, tw), lambda i, j, k: (i, j, k)),
        ],
        out_specs=[
            pl.BlockSpec((1, acc_h, acc_w), lambda i, j, k: (i, 0, 0)),
            pl.BlockSpec((1, acc_h, acc_w), lambda i, j, k: (i, 0, 0)),
        ],
        compiler_params=pltpu.CompilerParams(
            # N is independent (per-image partial outputs) -> shard across TensorCores
            # on v7x; tile axes are reductions into the resident output block.
            dimension_semantics=("parallel", "arbitrary", "arbitrary"),
            vmem_limit_bytes=vmem_limit),
    )(prediction, target, mask)

    # Tiny epilogue in plain JAX: (N, AH, AW) partials -> scalars + alpha/beta combine.
    l1_mean = jnp.sum(l1_part, dtype=jnp.float32) / float(n * c * h * w)
    cos_mean = jnp.sum(cos_part, dtype=jnp.float32) / float(n * h * w)
    return (alpha * l1_mean + beta * (1.0 - cos_mean)).astype(jnp.float32)


def _reference(prediction, target, mask, alpha=1.0, beta=1.0, eps=1e-8):
    """Pure-JAX reference matching torch.nn.L1Loss / nn.CosineSimilarity(dim=1)."""
    m = mask[:, None, :, :]
    mp = prediction * m
    mt = target * m
    l1 = jnp.mean(jnp.abs(mp - mt))
    dot = jnp.sum(mp * mt, axis=1)
    nx = jnp.sum(mp * mp, axis=1)
    ny = jnp.sum(mt * mt, axis=1)
    cos = dot / jnp.sqrt(jnp.maximum(nx * ny, eps * eps))
    return alpha * l1 + beta * (1.0 - jnp.mean(cos))


if __name__ == "__main__":
    key = jax.random.PRNGKey(0)
    k1, k2, k3 = jax.random.split(key, 3)

    N, C, H, W = 2, 4, 16, 16
    prediction = jax.random.normal(k1, (N, C, H, W), dtype=jnp.float32)
    target = jax.random.normal(k2, (N, C, H, W), dtype=jnp.float32)
    mask = jax.random.bernoulli(k3, p=0.7, shape=(N, H, W)).astype(jnp.float32)

    loss = jax.block_until_ready(my_criterion(prediction, target, mask,
                                              alpha=1.0, beta=1.0))
    ref = jax.block_until_ready(_reference(prediction, target, mask))
    assert jnp.isfinite(loss), "non-finite loss"
    assert jnp.allclose(loss, ref, rtol=1e-5, atol=1e-5), (loss, ref)

    # bf16 inputs (kernel upcasts in VMEM; halves HBM traffic on v5e/v6e).
    pred_bf = prediction.astype(jnp.bfloat16)
    targ_bf = target.astype(jnp.bfloat16)
    loss_bf = jax.block_until_ready(my_criterion(pred_bf, targ_bf, mask))
    ref_bf = jax.block_until_ready(_reference(pred_bf.astype(jnp.float32),
                                              targ_bf.astype(jnp.float32), mask))
    assert jnp.allclose(loss_bf, ref_bf, rtol=1e-4, atol=1e-4), (loss_bf, ref_bf)

    print("KERNEL_OK")
</pallas_src>

<mosaic_0001>
module attributes {stable_mosaic.version = 11 : i64} {
  func.func @_criterion_kernel(%arg0: i32, %arg1: i32, %arg2: i32, %arg3: memref<1x4x16x16xf32, #tpu.memory_space<vmem>>, %arg4: memref<1x4x16x16xf32, #tpu.memory_space<vmem>>, %arg5: memref<1x16x16xf32, #tpu.memory_space<vmem>>, %arg6: memref<1x8x16xf32, #tpu.memory_space<vmem>>, %arg7: memref<1x8x16xf32, #tpu.memory_space<vmem>>) attributes {dimension_semantics = [#tpu.dimension_semantics<parallel>, #tpu.dimension_semantics<arbitrary>, #tpu.dimension_semantics<arbitrary>], iteration_bounds = array<i64: 2, 1, 1>, scalar_prefetch = 0 : i64, scratch_operands = 0 : i64, tpu.core_type = #tpu.core_type<tc>, window_params = [{transform_indices = @transform_0, window_bounds = array<i64: 1, 4, 16, 16>}, {transform_indices = @transform_1, window_bounds = array<i64: 1, 4, 16, 16>}, {transform_indices = @transform_2, window_bounds = array<i64: 1, 16, 16>}, {transform_indices = @transform_3, window_bounds = array<i64: 1, 8, 16>}, {transform_indices = @transform_4, window_bounds = array<i64: 1, 8, 16>}]} {
    %c0_i32 = arith.constant 0 : i32
    %0 = arith.cmpi eq, %arg1, %c0_i32 : i32
    %c0_i32_0 = arith.constant 0 : i32
    %1 = arith.cmpi eq, %arg2, %c0_i32_0 : i32
    %2 = arith.andi %0, %1 : i1
    %3 = arith.extui %2 : i1 to i32
    %c0_i32_1 = arith.constant 0 : i32
    %4 = arith.cmpi ne, %3, %c0_i32_1 : i32
    scf.if %4 {
      %cst_47 = arith.constant 0.000000e+00 : f32
      %82 = vector.broadcast %cst_47 : f32 to vector<1x8x16xf32>
      %c0_48 = arith.constant 0 : index
      %c0_49 = arith.constant 0 : index
      %c0_50 = arith.constant 0 : index
      %83 = vector.load %arg6[%c0_48, %c0_49, %c0_50] : memref<1x8x16xf32, #tpu.memory_space<vmem>>, vector<1x8x16xf32>
      tpu.vector_store %arg6[%c0_48, %c0_49, %c0_50], %82 {strides = array<i32>} : memref<1x8x16xf32, #tpu.memory_space<vmem>>, vector<1x8x16xf32>,
      %cst_51 = arith.constant 0.000000e+00 : f32
      %84 = vector.broadcast %cst_51 : f32 to vector<1x8x16xf32>
      %c0_52 = arith.constant 0 : index
      %c0_53 = arith.constant 0 : index
      %c0_54 = arith.constant 0 : index
      %85 = vector.load %arg7[%c0_52, %c0_53, %c0_54] : memref<1x8x16xf32, #tpu.memory_space<vmem>>, vector<1x8x16xf32>
      tpu.vector_store %arg7[%c0_52, %c0_53, %c0_54], %84 {strides = array<i32>} : memref<1x8x16xf32, #tpu.memory_space<vmem>>, vector<1x8x16xf32>,
    } else {
    }
    %c0 = arith.constant 0 : index
    %c0_2 = arith.constant 0 : index
    %c0_3 = arith.constant 0 : index
    %c0_4 = arith.constant 0 : index
    %5 = vector.load %arg3[%c0, %c0_2, %c0_3, %c0_4] : memref<1x4x16x16xf32, #tpu.memory_space<vmem>>, vector<1x1x16x16xf32>
    %6 = vector.shape_cast %5 : vector<1x1x16x16xf32> to vector<16x16xf32>
    %c0_5 = arith.constant 0 : index
    %c0_6 = arith.constant 0 : index
    %c0_7 = arith.constant 0 : index
    %c0_8 = arith.constant 0 : index
    %7 = vector.load %arg4[%c0_5, %c0_6, %c0_7, %c0_8] : memref<1x4x16x16xf32, #tpu.memory_space<vmem>>, vector<1x1x16x16xf32>
    %8 = vector.shape_cast %7 : vector<1x1x16x16xf32> to vector<16x16xf32>
    %9 = arith.subf %6, %8 : vector<16x16xf32>
    %10 = math.absf %9 : vector<16x16xf32>
    %11 = arith.mulf %6, %8 : vector<16x16xf32>
    %12 = arith.mulf %6, %6 : vector<16x16xf32>
    %13 = arith.mulf %8, %8 : vector<16x16xf32>
    %c0_9 = arith.constant 0 : index
    %c1 = arith.constant 1 : index
    %c0_10 = arith.constant 0 : index
    %c0_11 = arith.constant 0 : index
    %14 = vector.load %arg3[%c0_9, %c1, %c0_10, %c0_11] : memref<1x4x16x16xf32, #tpu.memory_space<vmem>>, vector<1x1x16x16xf32>
    %15 = vector.shape_cast %14 : vector<1x1x16x16xf32> to vector<16x16xf32>
    %c0_12 = arith.constant 0 : index
    %c1_13 = arith.constant 1 : index
    %c0_14 = arith.constant 0 : index
    %c0_15 = arith.constant 0 : index
    %16 = vector.load %arg4[%c0_12, %c1_13, %c0_14, %c0_15] : memref<1x4x16x16xf32, #tpu.memory_space<vmem>>, vector<1x1x16x16xf32>
    %17 = vector.shape_cast %16 : vector<1x1x16x16xf32> to vector<16x16xf32>
    %18 = arith.subf %15, %17 : vector<16x16xf32>
    %19 = math.absf %18 : vector<16x16xf32>
    %20 = arith.addf %10, %19 : vector<16x16xf32>
    %21 = arith.mulf %15, %17 : vector<16x16xf32>
    %22 = arith.addf %11, %21 : vector<16x16xf32>
    %23 = arith.mulf %15, %15 : vector<16x16xf32>
    %24 = arith.addf %12, %23 : vector<16x16xf32>
    %25 = arith.mulf %17, %17 : vector<16x16xf32>
    %26 = arith.addf %13, %25 : vector<16x16xf32>
    %c0_16 = arith.constant 0 : index
    %c2 = arith.constant 2 : index
    %c0_17 = arith.constant 0 : index
    %c0_18 = arith.constant 0 : index
    %27 = vector.load %arg3[%c0_16, %c2, %c0_17, %c0_18] : memref<1x4x16x16xf32, #tpu.memory_space<vmem>>, vector<1x1x16x16xf32>
    %28 = vector.shape_cast %27 : vector<1x1x16x16xf32> to vector<16x16xf32>
    %c0_19 = arith.constant 0 : index
    %c2_20 = arith.constant 2 : index
    %c0_21 = arith.constant 0 : index
    %c0_22 = arith.constant 0 : index
    %29 = vector.load %arg4[%c0_19, %c2_20, %c0_21, %c0_22] : memref<1x4x16x16xf32, #tpu.memory_space<vmem>>, vector<1x1x16x16xf32>
    %30 = vector.shape_cast %29 : vector<1x1x16x16xf32> to vector<16x16xf32>
    %31 = arith.subf %28, %30 : vector<16x16xf32>
    %32 = math.absf %31 : vector<16x16xf32>
    %33 = arith.addf %20, %32 : vector<16x16xf32>
    %34 = arith.mulf %28, %30 : vector<16x16xf32>
    %35 = arith.addf %22, %34 : vector<16x16xf32>
    %36 = arith.mulf %28, %28 : vector<16x16xf32>
    %37 = arith.addf %24, %36 : vector<16x16xf32>
    %38 = arith.mulf %30, %30 : vector<16x16xf32>
    %39 = arith.addf %26, %38 : vector<16x16xf32>
    %c0_23 = arith.constant 0 : index
    %c3 = arith.constant 3 : index
    %c0_24 = arith.constant 0 : index
    %c0_25 = arith.constant 0 : index
    %40 = vector.load %arg3[%c0_23, %c3, %c0_24, %c0_25] : memref<1x4x16x16xf32, #tpu.memory_space<vmem>>, vector<1x1x16x16xf32>
    %41 = vector.shape_cast %40 : vector<1x1x16x16xf32> to vector<16x16xf32>
    %c0_26 = arith.constant 0 : index
    %c3_27 = arith.constant 3 : index
    %c0_28 = arith.constant 0 : index
    %c0_29 = arith.constant 0 : index
    %42 = vector.load %arg4[%c0_26, %c3_27, %c0_28, %c0_29] : memref<1x4x16x16xf32, #tpu.memory_space<vmem>>, vector<1x1x16x16xf32>
    %43 = vector.shape_cast %42 : vector<1x1x16x16xf32> to vector<16x16xf32>
    %44 = arith.subf %41, %43 : vector<16x16xf32>
    %45 = math.absf %44 : vector<16x16xf32>
    %46 = arith.addf %33, %45 : vector<16x16xf32>
    %47 = arith.mulf %41, %43 : vector<16x16xf32>
    %48 = arith.addf %35, %47 : vector<16x16xf32>
    %49 = arith.mulf %41, %41 : vector<16x16xf32>
    %50 = arith.addf %37, %49 : vector<16x16xf32>
    %51 = arith.mulf %43, %43 : vector<16x16xf32>
    %52 = arith.addf %39, %51 : vector<16x16xf32>
    %c0_30 = arith.constant 0 : index
    %c0_31 = arith.constant 0 : index
    %c0_32 = arith.constant 0 : index
    %53 = vector.load %arg5[%c0_30, %c0_31, %c0_32] : memref<1x16x16xf32, #tpu.memory_space<vmem>>, vector<1x16x16xf32>
    %54 = vector.shape_cast %53 : vector<1x16x16xf32> to vector<16x16xf32>
    %55 = math.absf %54 : vector<16x16xf32>
    %56 = arith.mulf %55, %55 : vector<16x16xf32>
    %57 = arith.mulf %48, %56 : vector<16x16xf32>
    %58 = arith.mulf %50, %56 : vector<16x16xf32>
    %59 = arith.mulf %52, %56 : vector<16x16xf32>
    %60 = arith.mulf %58, %59 : vector<16x16xf32>
    %cst = arith.constant 1.000000e-16 : f32
    %61 = vector.broadcast %cst : f32 to vector<16x16xf32>
    %62 = arith.maximumf %60, %61 : vector<16x16xf32>
    %63 = math.rsqrt %62 : vector<16x16xf32>
    %64 = arith.mulf %57, %63 : vector<16x16xf32>
    %65 = arith.mulf %46, %55 : vector<16x16xf32>
    %c0_33 = arith.constant 0 : index
    %c0_34 = arith.constant 0 : index
    %c0_35 = arith.constant 0 : index
    %66 = vector.load %arg6[%c0_33, %c0_34, %c0_35] : memref<1x8x16xf32, #tpu.memory_space<vmem>>, vector<1x8x16xf32>
    %67 = vector.shape_cast %66 : vector<1x8x16xf32> to vector<8x16xf32>
    %68 = vector.shape_cast %65 : vector<16x16xf32> to vector<2x8x1x16xf32>
    %cst_36 = arith.constant dense<0.000000e+00> : vector<8x16xf32>
    %69 = vector.multi_reduction <add>, %68, %cst_36 [0, 2] : vector<2x8x1x16xf32> to vector<8x16xf32>
    %70 = arith.addf %67, %69 : vector<8x16xf32>
    %c0_37 = arith.constant 0 : index
    %c0_38 = arith.constant 0 : index
    %c0_39 = arith.constant 0 : index
    %71 = vector.load %arg6[%c0_37, %c0_38, %c0_39] : memref<1x8x16xf32, #tpu.memory_space<vmem>>, vector<1x8x16xf32>
    %72 = vector.shape_cast %71 : vector<1x8x16xf32> to vector<8x16xf32>
    %73 = vector.shape_cast %70 : vector<8x16xf32> to vector<1x8x16xf32>
    tpu.vector_store %arg6[%c0_37, %c0_38, %c0_39], %73 {strides = array<i32>} : memref<1x8x16xf32, #tpu.memory_space<vmem>>, vector<1x8x16xf32>,
    %c0_40 = arith.constant 0 : index
    %c0_41 = arith.constant 0 : index
    %c0_42 = arith.constant 0 : index
    %74 = vector.load %arg7[%c0_40, %c0_41, %c0_42] : memref<1x8x16xf32, #tpu.memory_space<vmem>>, vector<1x8x16xf32>
    %75 = vector.shape_cast %74 : vector<1x8x16xf32> to vector<8x16xf32>
    %76 = vector.shape_cast %64 : vector<16x16xf32> to vector<2x8x1x16xf32>
    %cst_43 = arith.constant dense<0.000000e+00> : vector<8x16xf32>
    %77 = vector.multi_reduction <add>, %76, %cst_43 [0, 2] : vector<2x8x1x16xf32> to vector<8x16xf32>
    %78 = arith.addf %75, %77 : vector<8x16xf32>
    %c0_44 = arith.constant 0 : index
    %c0_45 = arith.constant 0 : index
    %c0_46 = arith.constant 0 : index
    %79 = vector.load %arg7[%c0_44, %c0_45, %c0_46] : memref<1x8x16xf32, #tpu.memory_space<vmem>>, vector<1x8x16xf32>
    %80 = vector.shape_cast %79 : vector<1x8x16xf32> to vector<8x16xf32>
    %81 = vector.shape_cast %78 : vector<8x16xf32> to vector<1x8x16xf32>
    tpu.vector_store %arg7[%c0_44, %c0_45, %c0_46], %81 {strides = array<i32>} : memref<1x8x16xf32, #tpu.memory_space<vmem>>, vector<1x8x16xf32>,
    return
  }
  func.func @transform_0(%arg0: i32, %arg1: i32, %arg2: i32) -> (i32, i32, i32, i32) {
    %c0_i32 = arith.constant 0 : i32
    %c0_i32_0 = arith.constant 0 : i32
    return %arg0, %c0_i32, %arg1, %arg2 : i32, i32, i32, i32
  }
  func.func @transform_1(%arg0: i32, %arg1: i32, %arg2: i32) -> (i32, i32, i32, i32) {
    %c0_i32 = arith.constant 0 : i32
    %c0_i32_0 = arith.constant 0 : i32
    return %arg0, %c0_i32, %arg1, %arg2 : i32, i32, i32, i32
  }
  func.func @transform_2(%arg0: i32, %arg1: i32, %arg2: i32) -> (i32, i32, i32) {
    %c0_i32 = arith.constant 0 : i32
    return %arg0, %arg1, %arg2 : i32, i32, i32
  }
  func.func @transform_3(%arg0: i32, %arg1: i32, %arg2: i32) -> (i32, i32, i32) {
    %c0_i32 = arith.constant 0 : i32
    %c0_i32_0 = arith.constant 0 : i32
    %c0_i32_1 = arith.constant 0 : i32
    return %arg0, %c0_i32, %c0_i32_0 : i32, i32, i32
  }
  func.func @transform_4(%arg0: i32, %arg1: i32, %arg2: i32) -> (i32, i32, i32) {
    %c0_i32 = arith.constant 0 : i32
    %c0_i32_0 = arith.constant 0 : i32
    %c0_i32_1 = arith.constant 0 : i32
    return %arg0, %c0_i32, %c0_i32_0 : i32, i32, i32
  }
}

</mosaic_0001>

<bundles_post_ra>
// kernel: tpu_custom_call.1
= control target key start
LH: loop header
LB: loop body
LE: loop exit
PB: predicated region body
PF: predicated region fallthrough
CT: control target
= control target key end

     0   :  { %s1898_s0 = inlined_call_operand.hbm [shape: f32[2,4,16,16], index: 0, kind: input, shape index: {}]   ;;  %s1899_s1 = inlined_call_operand.hbm [shape: f32[2,4,16,16], index: 1, kind: input, shape index: {}]   ;;  %s1900_s2 = inlined_call_operand.hbm [shape: f32[2,16,16], index: 2, kind: input, shape index: {}]   ;;  %s1901_s3 = inlined_call_operand.hbm [shape: f32[2,8,16], index: 3, kind: output, shape index: {0}]   ;;  %s1902_s4 = inlined_call_operand.hbm [shape: f32[2,8,16], index: 4, kind: output, shape index: {1}]  }
   0x1   :  { %1907 = sst [smem:[#allocation18_spill]] %s1898_s0 }
   0x2   :  { %1908 = sst [smem:[#allocation19_spill]] %s1899_s1 }
   0x3   :  { %10 = vsyncpa [#allocation3], 0 }
   0x4   :  { %12 = vsyncpa [#allocation3 + $0x1], 0 }
   0x5   :  { %13 = vsyncpa [#allocation6], 0 }
   0x6   :  { %15 = vsyncpa [#allocation6 + $0x1], 0 }
   0x7   :  { %16 = vsyncpa [#allocation4], 0 }
   0x8   :  { %18 = vsyncpa [#allocation4 + $0x1], 0 }
   0x9   :  { %19 = vsyncpa [#allocation10], 0 }
   0xa   :  { %21 = vsyncpa [#allocation10 + $0x1], 0  ;;  %s1446_s15 = smov 0   ;;  %s1448_s16 = smov 0  }
   0xb   :  { %s1450_s17 = smov 0   ;;  %s1452_s18 = smov 0  }
   0xc   :  { %s1454_s19 = smov 0   ;;  %s1456_s20 = smov 0  }
   0xd LB: > { %1909 = sst [smem:[#allocation15_spill]] %s1398_s17  ;;  %s1477_s21 = sadd.s32 4294967295, %s1410_s20   ;;  %s1410_s20 = sphi %s1456_s20, %s27_s20   ;;  %s1406_s19 = sphi %s1454_s19, %s1928_s19   ;;  %s1402_s18 = sphi %s1452_s18, %s1927_s18   ;;  %s1398_s17 = sphi %s1450_s17, %s1923_s17   ;;  %s1394_s16 = sphi %s1448_s16, %s1926_s16   ;;  %s1390_s15 = sphi %s1446_s15, %s1925_s15  }
   0xe   : > { %s1088_s22 = sadd.s32 4294967294, %s1410_s20   ;;  %s46_s23 = sadd.s32 1, %s1406_s19 }
   0xf   : > { %s57_s24 = sadd.s32 1, %s1398_s17  ;;  %p48_p0 = scmp.ge.s32.totalorder %s46_s23, 2 }
  0x10   : > { %p64_p1 = scmp.ne.s32.totalorder %s1398_s17, %s1394_s16  ;;  %p65_p2 = scmp.eq.s32.totalorder %s1410_s20, 0 }
  0x11   : > { %p70_p3 = scmp.ne.s32.totalorder %s1394_s16, %s1390_s15  ;;  %s1930_s23 = smov (%p48_p0, %s46_s23), 0 }
  0x12   : > { %1910 = sst [smem:[#allocation16_spill]] %s1930_s23  ;;  %p1489_p4 = por %p65_p2, %p64_p1 }
  0x13   : > { %p71_p5 = scmp.eq.s32.totalorder %s1477_s21, 0  ;;  %s50_s26 = ssub.s32 %s1406_s19, %s1930_s23 }
  0x14   : > { %p154_p6 = scmp.eq.s32.totalorder %s1477_s21, 1  ;;  %p55_p7 = scmp.eq.s32.totalorder %s50_s26, 0 }
  0x15   : > { %p1497_p8 = por %p71_p5, %p70_p3  ;;  %p160_p10 = scmp.eq.s32.totalorder %s1088_s22, 1 }
  0x16   : > { %p1501_p9 = por %p154_p6, %p64_p1  ;;  %p1154_p13 = scmp.lt.s32.totalorder %s1410_s20, 2 }
  0x17   : > { %s1506_s29 = scalar_select %p55_p7, %s1398_s17, %s57_s24  }
  0x18   : > { %p1508_p11 = por %p160_p10, %p70_p3  ;;  %s1515_s5 = sand.u32 1, %s1398_s17  }
  0x19   : > { %1914 = sst [smem:[#allocation17_spill]] %s1506_s29  ;;  %s1091_s6 = sshll.u32 %s1515_s5, 6 }
  0x1a   : > { %s1124_s7 = sshll.u32 %s1406_s19, 10  ;;  %p1521_p0 = pnand %p1154_p13, %p1489_p4 }
  0x1b   : > { %s230_s9 = sand.u32 1, %s1410_s20   ;;  %s1917_s1 = sld [smem:[#allocation19_spill]] }
  0x1c   : > { %s234_s13 = scalar_lea.vmem [#allocation5], %s1091_s6  ;;  %p1100_p1 = scmp.ge.s32.totalorder %s1410_s20, 1 }
  0x1d   : > { %s244_s14 = sshll.u32 %s234_s13, 4  ;;  %p276_p2 = scmp.lt.s32.totalorder %s1410_s20, 3  ;;  %s245_s14 = int_to_ptr.vmem [resolvable:$true] %s244_s14 }
  0x1e   : > { %s1535_s22 = scalar_lea.sflag [#allocation6], %s230_s9  ;;  %p1214_p3 = pneg %p1521_p0 }
  0x1f   : > { %s1225_s24 = scalar_lea.vmem %s245_s14, 1024  ;;  %s1412_s25 = smov [#allocation5]  }
  0x20   : > { %p1226_p4 = scmp.ne.s32.totalorder %s245_s14, %s1225_s24  ;;  %s1230_s26 = sshll.u32 %s1412_s25, 4  ;;  %s1231_s26 = int_to_ptr.vmem [resolvable:$false] %s1230_s26 }
  0x21   : > { %s243_s12 = scalar_lea.hbm %s1917_s1, %s1124_s7  ;;  %s1232_s10 = scalar_lea.vmem %s1231_s26, 2048 }
  0x22   : > { %p1228_p5 = pnand %p1226_p4, %p1214_p3  ;;  %p1233_p7 = scmp.lt.s32.totalorder %s245_s14, %s1231_s26 }
  0x23   : > { %p1234_p10 = scmp.lt.s32.totalorder %s1232_s10, %s1225_s24 }
  0x24   : > { %p1229_p6 = pneg %p1228_p5 }
  0x25   : > { %p1235_p13 = por %p1234_p10, %p1233_p7 }
  0x27   : > { %p1236_p12 = pnand %p1235_p13, %p1229_p6 }
  0x29   : > { %1239 = shalt.err (!%p1236_p12)
}
  0x2a   : > { %s1905_s11 = smov 128   ;;  %s1414_s9 = smov 8  }
  0x2b   : > { %1143 = dma.hbm_to_vmem [thread:$0]  (!%p1521_p0), %s243_s12, 1024, %s245_s14, %s1535_s22, %s1905_s11, %s1905_s11, %s1414_s9  }
  0x2c   : > { %p1552_p4 = pnand %p1100_p1, %p276_p2  ;;  %s1919_s0 = sld [smem:[#allocation18_spill]] }
  0x2d   : > { %s210_s10 = scalar_lea.vmem [#allocation2], %s1091_s6  ;;  %s1097_s23 = sshll.u32 %s1515_s5, 4 }
  0x2e   : > { %s220_s1 = sshll.u32 %s210_s10, 4  ;;  %s207_s29 = scalar_lea.sflag [#allocation3], %s1515_s5  ;;  %s221_s1 = int_to_ptr.vmem [resolvable:$true] %s220_s1 }
  0x2f   : > { %s1253_s17 = scalar_lea.vmem %s221_s1, 1024  ;;  %s1415_s12 = smov [#allocation2]  }
  0x30   : > { %p1254_p12 = scmp.ne.s32.totalorder %s221_s1, %s1253_s17  ;;  %s1258_s14 = sshll.u32 %s1415_s12, 4  ;;  %s1259_s14 = int_to_ptr.vmem [resolvable:$false] %s1258_s14 }
  0x31   : > { %s1260_s11 = scalar_lea.vmem %s1259_s14, 2048  ;;  %p1261_p2 = scmp.lt.s32.totalorder %s221_s1, %s1259_s14 }
  0x32   : > { %s219_s26 = scalar_lea.hbm %s1919_s0, %s1124_s7  ;;  %p1256_p5 = pnand %p1254_p12, %p1214_p3 }
  0x33   : > { %p1262_p6 = scmp.lt.s32.totalorder %s1260_s11, %s1253_s17 }
  0x34   : > { %p1257_p1 = pneg %p1256_p5 }
  0x35   : > { %p1263_p7 = por %p1262_p6, %p1261_p2 }
  0x37   : > { %p1264_p10 = pnand %p1263_p7, %p1257_p1 }
  0x39   : > { %1267 = shalt.err (!%p1264_p10)
}
  0x3a   : > { %s1920_s6 = smov 128   ;;  %s1126_s5 = sshll.u32 %s1406_s19, 8 }
  0x3b   : > { %1140 = dma.hbm_to_vmem [thread:$0]  (!%p1521_p0), %s219_s26, 1024, %s221_s1, %s207_s29, %s1920_s6, %s1920_s6, %s1414_s9  }
  0x3c   : > { %s258_s7 = scalar_lea.vmem [#allocation7], %s1097_s23  ;;  %s267_s12 = scalar_lea.hbm %s1900_s2, %s1126_s5 }
  0x3d   : > { %s268_s24 = sshll.u32 %s258_s7, 4  ;;  %s1416_s11 = smov [#allocation7]   ;;  %s269_s24 = int_to_ptr.vmem [resolvable:$true] %s268_s24 }
  0x3e   : > { %s1281_s17 = scalar_lea.vmem %s269_s24, 256  ;;  %s1286_s14 = sshll.u32 %s1416_s11, 4  ;;  %s1287_s14 = int_to_ptr.vmem [resolvable:$false] %s1286_s14 }
  0x3f   : > { %p1282_p13 = scmp.ne.s32.totalorder %s269_s24, %s1281_s17  ;;  %s1288_s0 = scalar_lea.vmem %s1287_s14, 512 }
  0x40   : > { %p1289_p1 = scmp.lt.s32.totalorder %s269_s24, %s1287_s14  ;;  %p1290_p2 = scmp.lt.s32.totalorder %s1288_s0, %s1281_s17 }
  0x41   : > { %p1284_p12 = pnand %p1282_p13, %p1214_p3 }
  0x42   : > { %p1291_p6 = por %p1290_p2, %p1289_p1 }
  0x43   : > { %p1285_p5 = pneg %p1284_p12 }
  0x45   : > { %p1292_p7 = pnand %p1291_p6, %p1285_p5 }
  0x47   : > { %1295 = shalt.err (!%p1292_p7)
}
  0x48   : > { %1146 = dma.hbm_to_vmem [thread:$0]  (!%p1521_p0), %s267_s12, 256, %s269_s24, %s1535_s22, %s1920_s6, %s1920_s6, %s1414_s9  }
  0x49   : > { %280 = sbr.rel (%p1552_p4) target bundleno = 197 (0xc5), region = 32  ;;  %s1589_s1 = sand.u32 (!%p1552_p4), 1, %s1394_s16  }
  0x4a   : > { %s1101_s0 = sshll.u32 (!%p1552_p4), %s1589_s1, 6  ;;  %s283_s23 = scalar_lea.sflag (!%p1552_p4), [#allocation3], %s1589_s1 }
  0x4b   : > { %s1593_s29 = scalar_lea.vmem (!%p1552_p4), [#allocation2], %s1101_s0 }
  0x4e   : > { %1373 = dma.done.wait (%p1497_p8), %s283_s23, 1024  }
  0x4f   : > { %1375 = vsyncadd (%p1497_p8), %s283_s23, 4294966272  ;;  %s291_s8 = sand.u32 1, %s1477_s21   ;;  %s1600_s9 = scalar_lea.vmem [#allocation5], %s1101_s0 }
  0x50   : > { %s292_s22 = scalar_lea.sflag [#allocation6], %s291_s8 }
  0x51   : > { %1377 = dma.done.wait (%p1497_p8), %s292_s22, 1280  }
  0x52   : > { %1379 = vsyncadd (%p1497_p8), %s292_s22, 4294966016  ;;  %s1104_s13 = sshll.u32 %s1589_s1, 3  ;;  %vm353_vm0 = vcmask 130048   ;;  %v471_v0 = vlaneseq  ;;  %v1417_v1 = vmov 0.0   ;;  %v1418_v2 = vmov 1966171168  }
  0x53   : > { %s1607_s26 = scalar_lea.vmem [#allocation8], %s1104_s13  ;;  %v469_v3 = vunpack.c.l.s4 %v1418_v2  ;;  %s1611_s21 = scalar_lea.vmem [#allocation9], %s1104_s13  ;;  %v1616_v6 = vld [vmem:[%s1593_s29] sm:$0xff]  ;;  %v1619_v7 = vld [vmem:[%s1593_s29 + $0x8] sm:$0xff]  ;;  %v1638_v15 = vld [vmem:[%s1593_s29 + $0x10] sm:$0xff]  ;;  %vm581_vm1 = vcmask 122880  }
  0x54   : > { %354 = vst.msk [vmem:[%s1607_s26] sm:$0xff] %vm353_vm0, %v1417_v1  ;;  %v472_v4 = vshrl.u32 %v471_v0, 7  ;;  %355 = vst.msk [vmem:[%s1611_s21] sm:$0xff] %vm353_vm0, %v1417_v1  ;;  %v1622_v8 = vld [vmem:[%s1600_s9] sm:$0xff]  ;;  %v1627_v10 = vld [vmem:[%s1600_s9 + $0x8] sm:$0xff]  ;;  %v366_v12 = vmul.f32 %v1616_v6, %v1616_v6  ;;  %v367_v13 = vmul.f32 %v1619_v7, %v1619_v7  ;;  %v386_v21 = vmul.f32 %v1638_v15, %v1638_v15  ;;  %s1103_s27 = sshll.u32 %s1589_s1, 4 }
  0x55   : > { %v470_v5 = vunpack.c.0.s8 %v469_v3  ;;  %v360_v11 = vsub.f32 %v1616_v6, %v1622_v8  ;;  %v368_v14 = vmul.f32 %v1622_v8, %v1622_v8  ;;  %v1641_v16 = vld [vmem:[%s1593_s29 + $0x18] sm:$0xff]  ;;  %v361_v17 = vsub.f32 %v1619_v7, %v1627_v10  ;;  %v1648_v19 = vld [vmem:[%s1600_s9 + $0x10] sm:$0xff]  ;;  %v1665_v27 = vld [vmem:[%s1593_s29 + $0x20] sm:$0xff]  ;;  %s304_s6 = scalar_lea.vmem [#allocation7], %s1103_s27  ;;  %s1120_s5 = sshll.u32 %s1402_s18, 7 }
  0x56   : > { %v369_v18 = vmul.f32 %v1627_v10, %v1627_v10  ;;  %v1651_v20 = vld [vmem:[%s1600_s9 + $0x18] sm:$0xff]  ;;  %v387_v22 = vmul.f32 %v1641_v16, %v1641_v16  ;;  %v376_v24 = vsub.f32 %v1638_v15, %v1648_v19  ;;  %v390_v26 = vmul.f32 %v1648_v19, %v1648_v19  ;;  %v1668_v28 = vld [vmem:[%s1593_s29 + $0x28] sm:$0xff]  ;;  %v1673_v33 = vld [vmem:[%s1600_s9 + $0x20] sm:$0xff]  ;;  %s906_s7 = sshll.u32 %s1607_s26, 4  ;;  %s1792_s10 = scalar_lea.hbm %s1901_s3, %s1120_s5  ;;  %s1794_s7 = int_to_ptr.vmem [resolvable:$true] %s906_s7 }
  0x57   : > { %v1624_v9 = vsub.s32 %v470_v5, %v472_v4  ;;  %v362_v23 = vand.u32 2147483647, %v360_v11  ;;  %v377_v25 = vsub.f32 %v1641_v16, %v1651_v20  ;;  %v363_v29 = vand.u32 2147483647, %v361_v17  ;;  %v1676_v37 = vld [vmem:[%s1600_s9 + $0x28] sm:$0xff]  ;;  %v1689_v47 = vld [vmem:[%s1593_s29 + $0x30] sm:$0xff] }
  0x58   : > { %v388_v30 = vadd.f32 %v386_v21, %v366_v12  ;;  %v389_v31 = vadd.f32 %v387_v22, %v367_v13  ;;  %v391_v32 = vmul.f32 %v1651_v20, %v1651_v20  ;;  %v378_v34 = vand.u32 2147483647, %v376_v24  ;;  %v1692_v48 = vld [vmem:[%s1593_s29 + $0x38] sm:$0xff]  ;;  %v1697_v53 = vld [vmem:[%s1600_s9 + $0x30] sm:$0xff]  ;;  %s888_s12 = scalar_lea.sflag [#allocation4], %s1589_s1  ;;  %s1296_s17 = scalar_lea.vmem %s1794_s7, 128 }
  0x59   : > { %v379_v35 = vand.u32 2147483647, %v377_v25  ;;  %v392_v36 = vadd.f32 %v390_v26, %v368_v14  ;;  %v400_v38 = vsub.f32 %v1665_v27, %v1673_v33  ;;  %v401_v40 = vsub.f32 %v1668_v28, %v1676_v37  ;;  %v1700_v54 = vld [vmem:[%s1600_s9 + $0x38] sm:$0xff]  ;;  %v442_v59 = vld [vmem:[%s304_s6] sm:$0xff]  ;;  %p1297_p8 = scmp.ne.s32.totalorder %s1794_s7, %s1296_s17  ;;  %s1419_s11 = smov [#allocation8]  }
  0x5a   : > { %v393_v39 = vadd.f32 %v391_v32, %v369_v18  ;;  %v410_v41 = vmul.f32 %v1665_v27, %v1665_v27  ;;  %v411_v42 = vmul.f32 %v1668_v28, %v1668_v28  ;;  %v380_v43 = vadd.f32 %v378_v34, %v362_v23  ;;  %v443_v60 = vld [vmem:[%s304_s6 + $0x8] sm:$0xff]  ;;  %s1300_s14 = sshll.u32 %s1419_s11, 4  ;;  %s1301_s14 = int_to_ptr.vmem [resolvable:$false] %s1300_s14 }
  0x5b   : > { %v381_v44 = vadd.f32 %v379_v35, %v363_v29  ;;  %v402_v45 = vand.u32 2147483647, %v400_v38  ;;  %v414_v46 = vmul.f32 %v1673_v33, %v1673_v33  ;;  %v403_v49 = vand.u32 2147483647, %v401_v40  ;;  %p1298_p0 = pnand %p1297_p8, %p1501_p9  ;;  %s1302_s0 = scalar_lea.vmem %s1301_s14, 256 }
  0x5c   : > { %v412_v50 = vadd.f32 %v410_v41, %v388_v30  ;;  %v413_v51 = vadd.f32 %v411_v42, %v389_v31  ;;  %v415_v52 = vmul.f32 %v1676_v37, %v1676_v37  ;;  %v424_v57 = vsub.f32 %v1689_v47, %v1697_v53  ;;  %p1303_p4 = scmp.lt.s32.totalorder %s1794_s7, %s1301_s14  ;;  %p1304_p10 = scmp.lt.s32.totalorder %s1302_s0, %s1296_s17 }
  0x5d   : > { %v404_v55 = vadd.f32 %v402_v45, %v380_v43  ;;  %v416_v56 = vadd.f32 %v414_v46, %v392_v36  ;;  %v425_v58 = vsub.f32 %v1692_v48, %v1700_v54  ;;  %v405_v61 = vadd.f32 %v403_v49, %v381_v44  ;;  %p1299_p3 = pneg %p1298_p0 }
  0x5e   : > { %v417_v62 = vadd.f32 %v415_v52, %v393_v39  ;;  %v434_v63 = vmul.f32 %v1689_v47, %v1689_v47  ;;  %v435_v0 = vmul.f32 %v1692_v48, %v1692_v48  ;;  %v426_v1 = vand.u32 2147483647, %v424_v57  ;;  %p1305_p13 = por %p1304_p10, %p1303_p4 }
  0x5f   : > { %v427_v2 = vand.u32 2147483647, %v425_v58  ;;  %v438_v3 = vmul.f32 %v1697_v53, %v1697_v53  ;;  %v439_v4 = vmul.f32 %v1700_v54, %v1700_v54  ;;  %v444_v12 = vand.u32 2147483647, %v442_v59 }
  0x60   : > { %v436_v5 = vadd.f32 %v434_v63, %v412_v50  ;;  %v437_v11 = vadd.f32 %v435_v0, %v413_v51  ;;  %v445_v13 = vand.u32 2147483647, %v443_v60  ;;  %v428_v14 = vadd.f32 %v426_v1, %v404_v55  ;;  %p1306_p12 = pnand %p1305_p13, %p1299_p3 }
  0x61   : > { %v429_v17 = vadd.f32 %v427_v2, %v405_v61  ;;  %v440_v18 = vadd.f32 %v438_v3, %v416_v56  ;;  %v441_v21 = vadd.f32 %v439_v4, %v417_v62  ;;  %v1716_v22 = vmul.f32 %v444_v12, %v444_v12 }
  0x62   : > { %v1718_v23 = vmul.f32 %v445_v13, %v445_v13  ;;  %v364_v24 = vmul.f32 %v1622_v8, %v1616_v6  ;;  %v365_v25 = vmul.f32 %v1627_v10, %v1619_v7  ;;  %v462_v26 = vmul.f32 %v444_v12, %v428_v14 }
  0x63   : > { %v463_v29 = vmul.f32 %v445_v13, %v429_v17  ;;  %v382_v30 = vmul.f32 %v1648_v19, %v1638_v15  ;;  %v383_v31 = vmul.f32 %v1651_v20, %v1641_v16  ;;  %v450_v32 = vmul.f32 %v1716_v22, %v436_v5 }
  0x64   : > { %v451_v34 = vmul.f32 %v1718_v23, %v437_v11  ;;  %v452_v35 = vmul.f32 %v1716_v22, %v440_v18  ;;  %v453_v36 = vmul.f32 %v1718_v23, %v441_v21  ;;  %v467_v6 = vcombine.high %v462_v26, %v462_v26 }
  0x65   : > { %v474_v8 = vrot.slane %v462_v26, %v1624_v9  ;;  %v516_v7 = vcombine.high %v463_v29, %v463_v29  ;;  %v523_v10 = vrot.slane %v463_v29, %v1624_v9  ;;  %v1734_v15 = vadd.f32 %v382_v30, %v364_v24 }
  0x66   : > { %v454_v38 = vmul.f32 %v452_v35, %v450_v32  ;;  %v455_v39 = vmul.f32 %v453_v36, %v451_v34  ;;  %v1736_v19 = vadd.f32 %v383_v31, %v365_v25  ;;  %v481_v16 = vrot.slane %v467_v6, %v1624_v9 }
  0x67   : > { %v482_v20 = vcombine.high %v474_v8, %v474_v8  ;;  %v490_v40 = vrot.slane %v474_v8, %v1624_v9  ;;  %v530_v41 = vrot.slane %v516_v7, %v1624_v9  ;;  %v531_v44 = vcombine.high %v523_v10, %v523_v10 }
  0x68   : > { %v456_v42 = vmax.f32 %v454_v38, 1e-16  ;;  %v457_v43 = vmax.f32 %v455_v39, 1e-16  ;;  %v539_v45 = vrot.slane %v523_v10, %v1624_v9  ;;  %v483_v46 = vcombine.high %v481_v16, %v481_v16 }
  0x69   : > { %v497_v49 = vrot.slane %v481_v16, %v1624_v9  ;;  %v504_v50 = vrot.slane %v482_v20, %v1624_v9  ;;  %v512_v51 = vcombine.high %v490_v40, %v490_v40  ;;  %v532_v52 = vcombine.high %v530_v41, %v530_v41 }
  0x6a   : > { %1208 = vrsqrt.f32 %v456_v42  ;;  %v546_v55 = vrot.slane %v530_v41, %v1624_v9  ;;  %v553_v56 = vrot.slane %v531_v44, %v1624_v9  ;;  %v511_v57 = vrot.slane %v483_v46, %v1624_v9 }
  0x6b   : > { %1210 = vrsqrt.f32 %v457_v43  ;;  %v513_v58 = vcombine.high %v497_v49, %v497_v49  ;;  %v514_v59 = vcombine.high %v504_v50, %v504_v50  ;;  %v560_v60 = vrot.slane %v532_v52, %v1624_v9 }
  0x6c   : > { %v561_v61 = vcombine.high %v539_v45, %v539_v45  ;;  %v562_v62 = vcombine.high %v546_v55, %v546_v55  ;;  %v563_v63 = vcombine.high %v553_v56, %v553_v56  ;;  %v515_v0 = vcombine.high %v511_v57, %v511_v57 }
  0x6d   : > { %v582_v1 = vsel %vm581_vm1, %v490_v40, 0.0  ;;  %v583_v2 = vsel %vm581_vm1, %v539_v45, 0.0  ;;  %v591_v3 = vsel %vm581_vm1, %v504_v50, 0.0  ;;  %v564_v4 = vcombine.high %v560_v60, %v560_v60 }
  0x6e   : > { %v584_v5 = vadd.f32 %v583_v2, %v582_v1  ;;  %v592_v11 = vsel %vm581_vm1, %v553_v56, 0.0  ;;  %v600_v12 = vsel %vm581_vm1, %v512_v51, 0.0  ;;  %v601_v14 = vsel %vm581_vm1, %v561_v61, 0.0 }
  0x6f   : > { %v593_v13 = vadd.f32 %v592_v11, %v591_v3  ;;  %v609_v17 = vsel %vm581_vm1, %v514_v59, 0.0  ;;  %v610_v18 = vsel %vm581_vm1, %v563_v63, 0.0  ;;  %v602_v24 = vadd.f32 %v601_v14, %v600_v12 }
  0x70   : > { %v585_v21 = vrot.slane %v584_v5, 4  ;;  %v611_v25 = vadd.f32 %v610_v18, %v609_v17  ;;  %v618_v26 = vsel %vm581_vm1, %v497_v49, 0.0  ;;  %v619_v30 = vsel %vm581_vm1, %v546_v55, 0.0 }
  0x71   : > { %v594_v29 = vrot.slane %v593_v13, 4  ;;  %v627_v31 = vsel %vm581_vm1, %v511_v57, 0.0  ;;  %v628_v32 = vsel %vm581_vm1, %v560_v60, 0.0  ;;  %v603_v35 = vrot.slane %v602_v24, 4 }
  0x72   : > { %v586_v34 = vadd.f32 %v585_v21, %v584_v5  ;;  %v612_v36 = vrot.slane %v611_v25, 4  ;;  %v620_v6 = vadd.f32 %v619_v30, %v618_v26  ;;  %vm662_vm2 = vcmask 1041409  }
  0x73   : > { %v595_v8 = vadd.f32 %v594_v29, %v593_v13  ;;  %v629_v7 = vadd.f32 %v628_v32, %v627_v31  ;;  %v636_v10 = vsel %vm581_vm1, %v513_v58, 0.0  ;;  %v637_v38 = vsel %vm581_vm1, %v562_v62, 0.0 }
  0x74   : > { %vm664_vm3 = vcmask 1042434   ;;  %v587_v39 = vrot.slane %v586_v34, 2  ;;  %v604_v16 = vadd.f32 %v603_v35, %v602_v24  ;;  %v613_v20 = vadd.f32 %v612_v36, %v611_v25 }
  0x75   : > { %v621_v40 = vrot.slane %v620_v6, 4  ;;  %vm666_vm4 = vcmask 1043459   ;;  %v596_v41 = vrot.slane %v595_v8, 2  ;;  %v630_v42 = vrot.slane %v629_v7, 4 }
  0x76   : > { %v638_v43 = vadd.f32 %v637_v38, %v636_v10  ;;  %v645_v44 = vsel %vm581_vm1, %v515_v0, 0.0  ;;  %vm668_vm5 = vcmask 1044484   ;;  %v588_v45 = vadd.f32 %v587_v39, %v586_v34 }
  0x77   : > { %v605_v46 = vrot.slane %v604_v16, 2  ;;  %v614_v49 = vrot.slane %v613_v20, 2  ;;  %v622_v50 = vadd.f32 %v621_v40, %v620_v6  ;;  %vm670_vm6 = vcmask 1045509   ;;  %v1209_v51 = vpop.eup %1208 }
  0x78   : > { %v597_v52 = vadd.f32 %v596_v41, %v595_v8  ;;  %v631_v55 = vadd.f32 %v630_v42, %v629_v7  ;;  %v639_v56 = vrot.slane %v638_v43, 4  ;;  %v646_v57 = vsel %vm581_vm1, %v564_v4, 0.0  ;;  %v1211_v58 = vpop.eup %1210 }
  0x79   : > { %v589_v59 = vrot.slane %v588_v45, 1  ;;  %v606_v60 = vadd.f32 %v605_v46, %v604_v16  ;;  %v615_v61 = vadd.f32 %v614_v49, %v613_v20  ;;  %v623_v62 = vrot.slane %v622_v50, 2 }
  0x7a   : > { %v598_v63 = vrot.slane %v597_v52, 1  ;;  %v632_v1 = vrot.slane %v631_v55, 2  ;;  %v640_v0 = vadd.f32 %v639_v56, %v638_v43  ;;  %v647_v2 = vadd.f32 %v646_v57, %v645_v44 }
  0x7b   : > { %v590_v3 = vadd.f32 %v589_v59, %v588_v45  ;;  %v607_v5 = vrot.slane %v606_v60, 1  ;;  %v616_v11 = vrot.slane %v615_v61, 1  ;;  %v624_v12 = vadd.f32 %v623_v62, %v622_v50 }
  0x7c   : > { %v599_v13 = vadd.f32 %v598_v63, %v597_v52  ;;  %v633_v14 = vadd.f32 %v632_v1, %v631_v55  ;;  %v641_v17 = vrot.slane %v640_v0, 2  ;;  %v648_v18 = vrot.slane %v647_v2, 4 }
  0x7d   : > { %v608_v21 = vadd.f32 %v607_v5, %v606_v60  ;;  %v617_v24 = vadd.f32 %v616_v11, %v615_v61  ;;  %v625_v4 = vrot.slane %v624_v12, 1  ;;  %v406_v25 = vmul.f32 %v1673_v33, %v1665_v27 }
  0x7e   : > { %v634_v26 = vrot.slane %v633_v14, 1  ;;  %v642_v29 = vadd.f32 %v641_v17, %v640_v0  ;;  %v649_v30 = vadd.f32 %v648_v18, %v647_v2  ;;  %v663_v31 = vsel %vm662_vm2, %v599_v13, %v590_v3 }
  0x7f   : > { %v626_v32 = vadd.f32 %v625_v4, %v624_v12  ;;  %v665_v34 = vsel %vm664_vm3, %v608_v21, %v663_v31  ;;  %v407_v35 = vmul.f32 %v1676_v37, %v1668_v28  ;;  %v408_v36 = vadd.f32 %v406_v25, %v1734_v15 }
  0x80   : > { %v635_v6 = vadd.f32 %v634_v26, %v633_v14  ;;  %v643_v8 = vrot.slane %v642_v29, 1  ;;  %v650_v7 = vrot.slane %v649_v30, 2  ;;  %v667_v10 = vsel %vm666_vm4, %v617_v24, %v665_v34 }
  0x81   : > { %v669_v27 = vsel %vm668_vm5, %v626_v32, %v667_v10  ;;  %v409_v33 = vadd.f32 %v407_v35, %v1736_v19  ;;  %v430_v38 = vmul.f32 %v1697_v53, %v1689_v47  ;;  %v431_v28 = vmul.f32 %v1700_v54, %v1692_v48  ;;  %v464_v53 = vld [vmem:[%s1607_s26] sm:$0xff] }
  0x82   : > { %v644_v37 = vadd.f32 %v643_v8, %v642_v29  ;;  %v651_v15 = vadd.f32 %v650_v7, %v649_v30  ;;  %v671_v39 = vsel %vm670_vm6, %v635_v6, %v669_v27  ;;  %vm672_vm7 = vcmask 1046534  }
  0x83   : > { %v432_v16 = vadd.f32 %v430_v38, %v408_v36  ;;  %v433_v20 = vadd.f32 %v431_v28, %v409_v33  ;;  %vm674_vm8 = vcmask 1047559  }
  0x84   : > { %v652_v40 = vrot.slane %v651_v15, 1  ;;  %v673_v41 = vsel %vm672_vm7, %v644_v37, %v671_v39 }
  0x85   : > { %v448_v19 = vmul.f32 %v1716_v22, %v432_v16  ;;  %v449_v47 = vmul.f32 %v1718_v23, %v433_v20 }
  0x86   : > { %v653_v42 = vadd.f32 %v652_v40, %v651_v15 }
  0x87   : > { %v460_v48 = vmul.f32 %v1209_v51, %v448_v19  ;;  %v461_v54 = vmul.f32 %v1211_v58, %v449_v47 }
  0x88   : > { %v675_v43 = vsel %vm674_vm8, %v653_v42, %v673_v41 }
  0x89   : > { %v677_v44 = vadd.f32 %v675_v43, %v464_v53  ;;  %v683_v45 = vcombine.high %v460_v48, %v460_v48  ;;  %v690_v46 = vrot.slane %v460_v48, %v1624_v9  ;;  %v732_v49 = vcombine.high %v461_v54, %v461_v54 }
  0x8a   : > { %v739_v22 = vrot.slane %v461_v54, %v1624_v9 }
  0x8b   : > { %679 = vst.msk [vmem:[%s1607_s26] sm:$0xff] %vm353_vm0, %v677_v44  ;;  %v697_v23 = vrot.slane %v683_v45, %v1624_v9  ;;  %v698_v50 = vcombine.high %v690_v46, %v690_v46  ;;  %v706_v51 = vrot.slane %v690_v46, %v1624_v9  ;;  %v746_v52 = vrot.slane %v732_v49, %v1624_v9 }
  0x8c   : > { %v747_v55 = vcombine.high %v739_v22, %v739_v22  ;;  %v755_v56 = vrot.slane %v739_v22, %v1624_v9 }
  0x8d   : > { %1309 = shalt.err (!%p1306_p12)
}
  0x8e   : > { %s1310_s23 = scalar_lea.hbm %s1792_s10, 128  ;;  %s1314_s22 = scalar_lea.hbm %s1901_s3, 256 }
  0x8f   : > { %p1311_p5 = scmp.ne.s32.totalorder %s1792_s10, %s1310_s23  ;;  %p1315_p6 = scmp.lt.s32.totalorder %s1792_s10, %s1901_s3 }
  0x90   : > { %p1316_p7 = scmp.lt.s32.totalorder %s1314_s22, %s1310_s23 }
  0x91   : > { %p1312_p1 = pnand %p1311_p5, %p1501_p9 }
  0x92   : > { %p1317_p8 = por %p1316_p7, %p1315_p6 }
  0x93   : > { %p1313_p2 = pneg %p1312_p1 }
  0x95   : > { %p1318_p0 = pnand %p1317_p8, %p1313_p2 }
  0x97   : > { %1321 = shalt.err (!%p1318_p0)
}
  0x98   : > { %1133 = dma.vmem_to_hbm [thread:$0]  (%p1501_p9), %s1794_s7, 128, %s1792_s10, %s888_s12   ;;  %v699_v57 = vcombine.high %v697_v23, %v697_v23  ;;  %v713_v58 = vrot.slane %v697_v23, %v1624_v9  ;;  %v720_v59 = vrot.slane %v698_v50, %v1624_v9  ;;  %v728_v60 = vcombine.high %v706_v51, %v706_v51 }
  0x99   : > { %v748_v61 = vcombine.high %v746_v52, %v746_v52  ;;  %v762_v62 = vrot.slane %v746_v52, %v1624_v9  ;;  %v769_v63 = vrot.slane %v747_v55, %v1624_v9  ;;  %v777_v1 = vcombine.high %v755_v56, %v755_v56  ;;  %s919_s26 = sshll.u32 %s1611_s21, 4  ;;  %s917_s7 = scalar_lea.hbm %s1902_s4, %s1120_s5  ;;  %s920_s26 = int_to_ptr.vmem [resolvable:$true] %s919_s26 }
  0x9a   : > { %v727_v0 = vrot.slane %v699_v57, %v1624_v9  ;;  %v729_v2 = vcombine.high %v713_v58, %v713_v58  ;;  %v730_v3 = vcombine.high %v720_v59, %v720_v59  ;;  %v797_v5 = vsel %vm581_vm1, %v706_v51, 0.0  ;;  %s893_s24 = scalar_lea.sflag [#allocation10], %s1589_s1  ;;  %s1322_s25 = scalar_lea.vmem %s920_s26, 128 }
  0x9b   : > { %v776_v11 = vrot.slane %v748_v61, %v1624_v9  ;;  %v778_v12 = vcombine.high %v762_v62, %v762_v62  ;;  %v779_v13 = vcombine.high %v769_v63, %v769_v63  ;;  %v798_v14 = vsel %vm581_vm1, %v755_v56, 0.0  ;;  %p1323_p3 = scmp.ne.s32.totalorder %s920_s26, %s1322_s25  ;;  %s1420_s10 = smov [#allocation9]  }
  0x9c   : > { %v731_v17 = vcombine.high %v727_v0, %v727_v0  ;;  %v799_v18 = vadd.f32 %v798_v14, %v797_v5  ;;  %v806_v21 = vsel %vm581_vm1, %v720_v59, 0.0  ;;  %v807_v24 = vsel %vm581_vm1, %v769_v63, 0.0  ;;  %s1326_s12 = sshll.u32 %s1420_s10, 4  ;;  %s1327_s12 = int_to_ptr.vmem [resolvable:$false] %s1326_s12 }
  0x9d   : > { %v780_v4 = vcombine.high %v776_v11, %v776_v11  ;;  %v808_v25 = vadd.f32 %v807_v24, %v806_v21  ;;  %v815_v26 = vsel %vm581_vm1, %v728_v60, 0.0  ;;  %v816_v29 = vsel %vm581_vm1, %v777_v1, 0.0  ;;  %p1324_p4 = pnand %p1323_p3, %p1501_p9  ;;  %s1328_s17 = scalar_lea.vmem %s1327_s12, 256 }
  0x9e   : > { %v800_v30 = vrot.slane %v799_v18, 4  ;;  %v817_v31 = vadd.f32 %v816_v29, %v815_v26  ;;  %v824_v9 = vsel %vm581_vm1, %v730_v3, 0.0  ;;  %v825_v32 = vsel %vm581_vm1, %v779_v13, 0.0  ;;  %p1329_p13 = scmp.lt.s32.totalorder %s920_s26, %s1327_s12  ;;  %p1330_p12 = scmp.lt.s32.totalorder %s1328_s17, %s1322_s25 }
  0x9f   : > { %v809_v34 = vrot.slane %v808_v25, 4  ;;  %v826_v35 = vadd.f32 %v825_v32, %v824_v9  ;;  %v833_v36 = vsel %vm581_vm1, %v713_v58, 0.0  ;;  %v834_v6 = vsel %vm581_vm1, %v762_v62, 0.0  ;;  %p1325_p10 = pneg %p1324_p4 }
  0xa0   : > { %v801_v8 = vadd.f32 %v800_v30, %v799_v18  ;;  %v818_v7 = vrot.slane %v817_v31, 4  ;;  %v835_v10 = vadd.f32 %v834_v6, %v833_v36  ;;  %v842_v27 = vsel %vm581_vm1, %v727_v0, 0.0  ;;  %p1331_p5 = por %p1330_p12, %p1329_p13 }
  0xa1   : > { %v810_v33 = vadd.f32 %v809_v34, %v808_v25  ;;  %v827_v38 = vrot.slane %v826_v35, 4  ;;  %v843_v28 = vsel %vm581_vm1, %v776_v11, 0.0  ;;  %v851_v37 = vsel %vm581_vm1, %v729_v2, 0.0  ;;  %v680_v34 = vld [vmem:[%s1611_s21] sm:$0xff] }
  0xa2   : > { %v802_v15 = vrot.slane %v801_v8, 2  ;;  %v819_v39 = vadd.f32 %v818_v7, %v817_v31  ;;  %v836_v16 = vrot.slane %v835_v10, 4  ;;  %v844_v20 = vadd.f32 %v843_v28, %v842_v27  ;;  %p1332_p1 = pnand %p1331_p5, %p1325_p10 }
  0xa3   : > { %v811_v40 = vrot.slane %v810_v33, 2  ;;  %v828_v41 = vadd.f32 %v827_v38, %v826_v35  ;;  %v852_v19 = vsel %vm581_vm1, %v778_v12, 0.0  ;;  %v860_v47 = vsel %vm581_vm1, %v731_v17, 0.0 }
  0xa4   : > { %v803_v53 = vadd.f32 %v802_v15, %v801_v8  ;;  %v820_v42 = vrot.slane %v819_v39, 2  ;;  %v837_v48 = vadd.f32 %v836_v16, %v835_v10  ;;  %v845_v54 = vrot.slane %v844_v20, 4 }
  0xa5   : > { %v812_v43 = vadd.f32 %v811_v40, %v810_v33  ;;  %v829_v44 = vrot.slane %v828_v41, 2  ;;  %v853_v45 = vadd.f32 %v852_v19, %v851_v37  ;;  %v861_v46 = vsel %vm581_vm1, %v780_v4, 0.0 }
  0xa6   : > { %v804_v49 = vrot.slane %v803_v53, 1  ;;  %v821_v22 = vadd.f32 %v820_v42, %v819_v39  ;;  %v838_v23 = vrot.slane %v837_v48, 2  ;;  %v846_v50 = vadd.f32 %v845_v54, %v844_v20 }
  0xa7   : > { %v813_v51 = vrot.slane %v812_v43, 1  ;;  %v830_v52 = vadd.f32 %v829_v44, %v828_v41  ;;  %v854_v55 = vrot.slane %v853_v45, 4  ;;  %v862_v56 = vadd.f32 %v861_v46, %v860_v47 }
  0xa8   : > { %v805_v57 = vadd.f32 %v804_v49, %v803_v53  ;;  %v822_v58 = vrot.slane %v821_v22, 1  ;;  %v839_v59 = vadd.f32 %v838_v23, %v837_v48  ;;  %v847_v60 = vrot.slane %v846_v50, 2 }
  0xa9   : > { %v814_v61 = vadd.f32 %v813_v51, %v812_v43  ;;  %v831_v62 = vrot.slane %v830_v52, 1  ;;  %v855_v63 = vadd.f32 %v854_v55, %v853_v45  ;;  %v863_v1 = vrot.slane %v862_v56, 4 }
  0xaa   : > { %v823_v0 = vadd.f32 %v822_v58, %v821_v22  ;;  %v840_v2 = vrot.slane %v839_v59, 1  ;;  %v848_v3 = vadd.f32 %v847_v60, %v846_v50 }
  0xab   : > { %v832_v5 = vadd.f32 %v831_v62, %v830_v52  ;;  %v856_v11 = vrot.slane %v855_v63, 2  ;;  %v864_v12 = vadd.f32 %v863_v1, %v862_v56  ;;  %v877_v13 = vsel %vm662_vm2, %v814_v61, %v805_v57 }
  0xac   : > { %v841_v14 = vadd.f32 %v840_v2, %v839_v59  ;;  %v849_v17 = vrot.slane %v848_v3, 1  ;;  %v878_v18 = vsel %vm664_vm3, %v823_v0, %v877_v13 }
  0xad   : > { %v857_v21 = vadd.f32 %v856_v11, %v855_v63  ;;  %v865_v24 = vrot.slane %v864_v12, 2  ;;  %v879_v4 = vsel %vm666_vm4, %v832_v5, %v878_v18 }
  0xae   : > { %v850_v25 = vadd.f32 %v849_v17, %v848_v3  ;;  %v880_v26 = vsel %vm668_vm5, %v841_v14, %v879_v4 }
  0xaf   : > { %v858_v29 = vrot.slane %v857_v21, 1  ;;  %v866_v30 = vadd.f32 %v865_v24, %v864_v12 }
  0xb0   : > { %v881_v31 = vsel %vm670_vm6, %v850_v25, %v880_v26 }
  0xb1   : > { %v859_v9 = vadd.f32 %v858_v29, %v857_v21  ;;  %v867_v32 = vrot.slane %v866_v30, 1 }
  0xb3   : > { %v868_v35 = vadd.f32 %v867_v32, %v866_v30  ;;  %v882_v36 = vsel %vm672_vm7, %v859_v9, %v881_v31 }
  0xb5   : > { %v883_v6 = vsel %vm674_vm8, %v868_v35, %v882_v36 }
  0xb6   : > { %v885_v8 = vadd.f32 %v883_v6, %v680_v34 }
  0xb8   : > { %886 = vst.msk [vmem:[%s1611_s21] sm:$0xff] %vm353_vm0, %v885_v8 }
  0xb9   : > { %1335 = shalt.err (!%p1332_p1)
}
  0xba   : > { %s1336_s18 = scalar_lea.hbm %s917_s7, 128  ;;  %s1340_s5 = scalar_lea.hbm %s1902_s4, 256 }
  0xbb   : > { %p1337_p2 = scmp.ne.s32.totalorder %s917_s7, %s1336_s18  ;;  %p1341_p8 = scmp.lt.s32.totalorder %s917_s7, %s1902_s4 }
  0xbc   : > { %p1342_p0 = scmp.lt.s32.totalorder %s1340_s5, %s1336_s18 }
  0xbd   : > { %p1338_p6 = pnand %p1337_p2, %p1501_p9 }
  0xbe   : > { %p1343_p3 = por %p1342_p0, %p1341_p8 }
  0xbf   : > { %p1339_p7 = pneg %p1338_p6 }
  0xc1   : > { %p1344_p4 = pnand %p1343_p3, %p1339_p7 }
  0xc3   : > { %1347 = shalt.err (!%p1344_p4)
}
  0xc4   : > { %1134 = dma.vmem_to_hbm [thread:$0]  (%p1501_p9), %s920_s26, 128, %s917_s7, %s893_s24  }
  0xc5 PF: > { %s931_s0 = sand.u32 1, %s1390_s15   ;;  %p1921_p10 = scmp.ge.s32.totalorder %s1410_s20, 2 }
  0xc6   : > { %s932_s23 = scalar_lea.sflag [#allocation4], %s931_s0 }
  0xc7   : > { %p1148_p13 = pnand %p1921_p10, %p1508_p11 }
  0xc9   : > { %p1149_p12 = pneg %p1148_p13 }
  0xcb   : > { %1381 = dma.done.wait (%p1149_p12), %s932_s23, 128  }
  0xcc   : > { %1383 = vsyncadd (%p1149_p12), %s932_s23, 4294967168  ;;  %s941_s29 = scalar_lea.sflag [#allocation10], %s931_s0 }
  0xcd   : > { %1385 = dma.done.wait (%p1149_p12), %s941_s29, 128  }
  0xce   : > { %1387 = vsyncadd (%p1149_p12), %s941_s29, 4294967168  ;;  %s27_s20 = sadd.s32 1, %s1410_s20   ;;  %s1922_s28 = sld [smem:[#allocation15_spill]] }
  0xcf   : > { %p24_p5 = scmp.ge.s32.totalorder %s27_s20, 4   ;;  %s1923_s17 = sld [smem:[#allocation17_spill]] }
  0xd0   : > { %s1924_s8 = sld [smem:[#allocation16_spill]]  ;;  %s1925_s15 = smov %s1394_s16 }
  0xd1   : > { %s1927_s18 = smov %s1406_s19 }
  0xd2   :  { %26 = sbr.rel (!%p24_p5) target bundleno = 13 (0xd), region = 128 }
  0xd4   : > { %s1926_s16 = smov %s1922_s28 }
  0xd6   : > { %s1928_s19 = smov %s1924_s8 }
  0xd7   :  { %946 = vsyncpa [#allocation3], 1 }
  0xd8   :  { %948 = vsyncpa [#allocation3 + $0x1], 1 }
  0xd9   :  { %949 = vsyncpa [#allocation6], 1 }
  0xda   :  { %951 = vsyncpa [#allocation6 + $0x1], 1 }
  0xdb   :  { %952 = vsyncpa [#allocation4], 1 }
  0xdc   :  { %954 = vsyncpa [#allocation4 + $0x1], 1 }
  0xdd   :  { %955 = vsyncpa [#allocation10], 1 }
  0xde   :  { %957 = vsyncpa [#allocation10 + $0x1], 1 }

</bundles_post_ra>
